<compile_context>
chip_gen: v6e
topology: v6e:2x2x1
jax: 0.10.0
libtpu: 0.0.40
codegen_flags: <defaults>
</compile_context>

<pallas_src>
import math

import jax
import jax.numpy as jnp
from jax.experimental import pallas as pl
from jax.experimental.pallas import tpu as pltpu

VIEWS = ("L-CC", "L-MLO", "R-CC", "R-MLO")

_LANES = 128                             # lane-dense last dim
_VMEM_BLOCK_BUDGET = 16 * 1024 * 1024    # live pipelined blocks (in+noise+out, 2x buffered)


def _make_add_noise_kernel(n_arrays, std):
    """Fused kernel: out_i = x_i + std * z_i for n_arrays equal-shape tiles."""
    std_f = float(std)

    def kernel(*refs):
        x_refs = refs[:n_arrays]
        z_refs = refs[n_arrays:2 * n_arrays]
        o_refs = refs[2 * n_arrays:]
        for x_ref, z_ref, o_ref in zip(x_refs, z_refs, o_refs):
            x = x_ref[...].astype(jnp.float32)
            z = z_ref[...]                                # f32 standard normal
            o_ref[...] = (x + std_f * z).astype(o_ref.dtype)

    return kernel


def _pick_tile_rows(rows, n_arrays, itemsize):
    # Per (rows=1) slice: n inputs (itemsize) + n f32 noise + n outputs
    # (itemsize), each double-buffered by the pipeline.
    bytes_per_row = _LANES * (2 * itemsize + 4) * n_arrays * 2
    t = max(8, (_VMEM_BLOCK_BUDGET // bytes_per_row) // 8 * 8)
    rows8 = ((rows + 7) // 8) * 8
    return min(t, rows8)


def _fused_add_noise(arrays, std, key):
    """Add N(0, std^2) noise to equal-shape/dtype arrays in ONE pallas_call."""
    shape = arrays[0].shape
    dtype = arrays[0].dtype
    total = math.prod(shape)
    n = len(arrays)

    rows = -(-total // _LANES)
    tile_rows = _pick_tile_rows(rows, n, jnp.dtype(dtype).itemsize)
    rows_padded = -(-rows // tile_rows) * tile_rows
    pad = rows_padded * _LANES - total

    xs2d = []
    for a in arrays:
        flat = a.reshape(-1)
        if pad:
            flat = jnp.pad(flat, (0, pad))
        xs2d.append(flat.reshape(rows_padded, _LANES))

    # One independent standard-normal stream per view, generated at the padded
    # lane-dense layout (no extra pad/reshape passes for the noise).
    noise_keys = jax.random.split(key, n)
    zs2d = [
        jax.random.normal(k, (rows_padded, _LANES), dtype=jnp.float32)
        for k in noise_keys
    ]

    blk = pl.BlockSpec((tile_rows, _LANES), lambda i: (i, 0))

    outs = pl.pallas_call(
        _make_add_noise_kernel(n, std),
        out_shape=tuple(
            jax.ShapeDtypeStruct((rows_padded, _LANES), dtype) for _ in range(n)
        ),
        grid_spec=pl.GridSpec(
            grid=(rows_padded // tile_rows,),
            in_specs=[blk] * (2 * n),          # n inputs + n noise arrays
            out_specs=tuple(blk for _ in range(n)),
        ),
        compiler_params=pltpu.CompilerParams(
            dimension_semantics=("parallel",),     # megacore-shardable on v7x
            vmem_limit_bytes=48 * 1024 * 1024,     # explicit; fits v7x 64 MiB VMEM
        ),
    )(*xs2d, *zs2d)

    if not isinstance(outs, (tuple, list)):
        outs = (outs,)
    return [o.reshape(-1)[:total].reshape(shape) for o in outs]


def all_views_gaussian_noise(x_dict, gaussian_noise_std, seed=0):
    """Pallas equivalent of AllViewsGaussianNoise.forward."""
    if not gaussian_noise_std:
        return x_dict

    # Group views sharing (shape, dtype) so they go through one fused launch
    # (a single launch in the common case where all 4 views match).
    groups = {}
    for view in VIEWS:
        key = (tuple(x_dict[view].shape), jnp.dtype(x_dict[view].dtype))
        groups.setdefault(key, []).append(view)

    root_key = jax.random.PRNGKey(seed)
    group_keys = jax.random.split(root_key, len(groups))

    out = {}
    for gkey, views in zip(group_keys, groups.values()):
        noisy = _fused_add_noise([x_dict[v] for v in views], gaussian_noise_std, gkey)
        for v, a in zip(views, noisy):
            out[v] = a
    return out


if __name__ == "__main__":
    key = jax.random.PRNGKey(0)
    N, C, H, W = 2, 4, 16, 16
    std = 0.05
    keys = jax.random.split(key, len(VIEWS))
    x = {
        view: jax.random.normal(k, (N, C, H, W), dtype=jnp.float32)
        for view, k in zip(VIEWS, keys)
    }

    out = all_views_gaussian_noise(x, std, seed=0)
    out = jax.tree_util.tree_map(jax.block_until_ready, out)

    # 1) Falsy std path is the identity (module returns x unchanged).
    assert all_views_gaussian_noise(x, 0.0) is x

    # 2) Shapes/dtypes preserved; noise present, bounded, and distinct per view.
    noise = {}
    for view in VIEWS:
        assert out[view].shape == x[view].shape
        assert out[view].dtype == x[view].dtype
        noise[view] = out[view] - x[view]
        assert bool(jnp.any(jnp.abs(noise[view]) > 0.0))
        assert bool(jnp.all(jnp.abs(noise[view]) < 10.0 * std))
    assert not bool(jnp.allclose(noise["L-CC"], noise["L-MLO"]))

    # 3) Loose statistical check: pooled noise ~ N(0, std^2).
    pooled = jnp.concatenate([noise[v].reshape(-1) for v in VIEWS])
    assert abs(float(pooled.mean())) < 0.1 * std
    assert 0.8 * std < float(pooled.std()) < 1.2 * std

    print("KERNEL_OK")
</pallas_src>

<mosaic_0001>
module attributes {stable_mosaic.version = 11 : i64} {
  func.func @kernel(%arg0: i32, %arg1: memref<16x128xf32, #tpu.memory_space<vmem>>, %arg2: memref<16x128xf32, #tpu.memory_space<vmem>>, %arg3: memref<16x128xf32, #tpu.memory_space<vmem>>, %arg4: memref<16x128xf32, #tpu.memory_space<vmem>>, %arg5: memref<16x128xf32, #tpu.memory_space<vmem>>, %arg6: memref<16x128xf32, #tpu.memory_space<vmem>>, %arg7: memref<16x128xf32, #tpu.memory_space<vmem>>, %arg8: memref<16x128xf32, #tpu.memory_space<vmem>>, %arg9: memref<16x128xf32, #tpu.memory_space<vmem>>, %arg10: memref<16x128xf32, #tpu.memory_space<vmem>>, %arg11: memref<16x128xf32, #tpu.memory_space<vmem>>, %arg12: memref<16x128xf32, #tpu.memory_space<vmem>>) attributes {dimension_semantics = [#tpu.dimension_semantics<parallel>], iteration_bounds = array<i64: 1>, scalar_prefetch = 0 : i64, scratch_operands = 0 : i64, tpu.core_type = #tpu.core_type<tc>, window_params = [{transform_indices = @transform_0, window_bounds = array<i64: 16, 128>}, {transform_indices = @transform_1, window_bounds = array<i64: 16, 128>}, {transform_indices = @transform_2, window_bounds = array<i64: 16, 128>}, {transform_indices = @transform_3, window_bounds = array<i64: 16, 128>}, {transform_indices = @transform_4, window_bounds = array<i64: 16, 128>}, {transform_indices = @transform_5, window_bounds = array<i64: 16, 128>}, {transform_indices = @transform_6, window_bounds = array<i64: 16, 128>}, {transform_indices = @transform_7, window_bounds = array<i64: 16, 128>}, {transform_indices = @transform_8, window_bounds = array<i64: 16, 128>}, {transform_indices = @transform_9, window_bounds = array<i64: 16, 128>}, {transform_indices = @transform_10, window_bounds = array<i64: 16, 128>}, {transform_indices = @transform_11, window_bounds = array<i64: 16, 128>}]} {
    %c0 = arith.constant 0 : index
    %c0_0 = arith.constant 0 : index
    %0 = vector.load %arg1[%c0, %c0_0] : memref<16x128xf32, #tpu.memory_space<vmem>>, vector<16x128xf32>
    %c0_1 = arith.constant 0 : index
    %c0_2 = arith.constant 0 : index
    %1 = vector.load %arg5[%c0_1, %c0_2] : memref<16x128xf32, #tpu.memory_space<vmem>>, vector<16x128xf32>
    %cst = arith.constant 5.000000e-02 : f32
    %2 = vector.broadcast %cst : f32 to vector<16x128xf32>
    %3 = arith.mulf %2, %1 : vector<16x128xf32>
    %4 = arith.addf %0, %3 : vector<16x128xf32>
    %c0_3 = arith.constant 0 : index
    %c0_4 = arith.constant 0 : index
    %5 = vector.load %arg9[%c0_3, %c0_4] : memref<16x128xf32, #tpu.memory_space<vmem>>, vector<16x128xf32>
    tpu.vector_store %arg9[%c0_3, %c0_4], %4 {strides = array<i32>} : memref<16x128xf32, #tpu.memory_space<vmem>>, vector<16x128xf32>,
    %c0_5 = arith.constant 0 : index
    %c0_6 = arith.constant 0 : index
    %6 = vector.load %arg2[%c0_5, %c0_6] : memref<16x128xf32, #tpu.memory_space<vmem>>, vector<16x128xf32>
    %c0_7 = arith.constant 0 : index
    %c0_8 = arith.constant 0 : index
    %7 = vector.load %arg6[%c0_7, %c0_8] : memref<16x128xf32, #tpu.memory_space<vmem>>, vector<16x128xf32>
    %cst_9 = arith.constant 5.000000e-02 : f32
    %8 = vector.broadcast %cst_9 : f32 to vector<16x128xf32>
    %9 = arith.mulf %8, %7 : vector<16x128xf32>
    %10 = arith.addf %6, %9 : vector<16x128xf32>
    %c0_10 = arith.constant 0 : index
    %c0_11 = arith.constant 0 : index
    %11 = vector.load %arg10[%c0_10, %c0_11] : memref<16x128xf32, #tpu.memory_space<vmem>>, vector<16x128xf32>
    tpu.vector_store %arg10[%c0_10, %c0_11], %10 {strides = array<i32>} : memref<16x128xf32, #tpu.memory_space<vmem>>, vector<16x128xf32>,
    %c0_12 = arith.constant 0 : index
    %c0_13 = arith.constant 0 : index
    %12 = vector.load %arg3[%c0_12, %c0_13] : memref<16x128xf32, #tpu.memory_space<vmem>>, vector<16x128xf32>
    %c0_14 = arith.constant 0 : index
    %c0_15 = arith.constant 0 : index
    %13 = vector.load %arg7[%c0_14, %c0_15] : memref<16x128xf32, #tpu.memory_space<vmem>>, vector<16x128xf32>
    %cst_16 = arith.constant 5.000000e-02 : f32
    %14 = vector.broadcast %cst_16 : f32 to vector<16x128xf32>
    %15 = arith.mulf %14, %13 : vector<16x128xf32>
    %16 = arith.addf %12, %15 : vector<16x128xf32>
    %c0_17 = arith.constant 0 : index
    %c0_18 = arith.constant 0 : index
    %17 = vector.load %arg11[%c0_17, %c0_18] : memref<16x128xf32, #tpu.memory_space<vmem>>, vector<16x128xf32>
    tpu.vector_store %arg11[%c0_17, %c0_18], %16 {strides = array<i32>} : memref<16x128xf32, #tpu.memory_space<vmem>>, vector<16x128xf32>,
    %c0_19 = arith.constant 0 : index
    %c0_20 = arith.constant 0 : index
    %18 = vector.load %arg4[%c0_19, %c0_20] : memref<16x128xf32, #tpu.memory_space<vmem>>, vector<16x128xf32>
    %c0_21 = arith.constant 0 : index
    %c0_22 = arith.constant 0 : index
    %19 = vector.load %arg8[%c0_21, %c0_22] : memref<16x128xf32, #tpu.memory_space<vmem>>, vector<16x128xf32>
    %cst_23 = arith.constant 5.000000e-02 : f32
    %20 = vector.broadcast %cst_23 : f32 to vector<16x128xf32>
    %21 = arith.mulf %20, %19 : vector<16x128xf32>
    %22 = arith.addf %18, %21 : vector<16x128xf32>
    %c0_24 = arith.constant 0 : index
    %c0_25 = arith.constant 0 : index
    %23 = vector.load %arg12[%c0_24, %c0_25] : memref<16x128xf32, #tpu.memory_space<vmem>>, vector<16x128xf32>
    tpu.vector_store %arg12[%c0_24, %c0_25], %22 {strides = array<i32>} : memref<16x128xf32, #tpu.memory_space<vmem>>, vector<16x128xf32>,
    return
  }
  func.func @transform_0(%arg0: i32) -> (i32, i32) {
    %c0_i32 = arith.constant 0 : i32
    %c0_i32_0 = arith.constant 0 : i32
    return %arg0, %c0_i32 : i32, i32
  }
  func.func @transform_1(%arg0: i32) -> (i32, i32) {
    %c0_i32 = arith.constant 0 : i32
    %c0_i32_0 = arith.constant 0 : i32
    return %arg0, %c0_i32 : i32, i32
  }
  func.func @transform_2(%arg0: i32) -> (i32, i32) {
    %c0_i32 = arith.constant 0 : i32
    %c0_i32_0 = arith.constant 0 : i32
    return %arg0, %c0_i32 : i32, i32
  }
  func.func @transform_3(%arg0: i32) -> (i32, i32) {
    %c0_i32 = arith.constant 0 : i32
    %c0_i32_0 = arith.constant 0 : i32
    return %arg0, %c0_i32 : i32, i32
  }
  func.func @transform_4(%arg0: i32) -> (i32, i32) {
    %c0_i32 = arith.constant 0 : i32
    %c0_i32_0 = arith.constant 0 : i32
    return %arg0, %c0_i32 : i32, i32
  }
  func.func @transform_5(%arg0: i32) -> (i32, i32) {
    %c0_i32 = arith.constant 0 : i32
    %c0_i32_0 = arith.constant 0 : i32
    return %arg0, %c0_i32 : i32, i32
  }
  func.func @transform_6(%arg0: i32) -> (i32, i32) {
    %c0_i32 = arith.constant 0 : i32
    %c0_i32_0 = arith.constant 0 : i32
    return %arg0, %c0_i32 : i32, i32
  }
  func.func @transform_7(%arg0: i32) -> (i32, i32) {
    %c0_i32 = arith.constant 0 : i32
    %c0_i32_0 = arith.constant 0 : i32
    return %arg0, %c0_i32 : i32, i32
  }
  func.func @transform_8(%arg0: i32) -> (i32, i32) {
    %c0_i32 = arith.constant 0 : i32
    %c0_i32_0 = arith.constant 0 : i32
    return %arg0, %c0_i32 : i32, i32
  }
  func.func @transform_9(%arg0: i32) -> (i32, i32) {
    %c0_i32 = arith.constant 0 : i32
    %c0_i32_0 = arith.constant 0 : i32
    return %arg0, %c0_i32 : i32, i32
  }
  func.func @transform_10(%arg0: i32) -> (i32, i32) {
    %c0_i32 = arith.constant 0 : i32
    %c0_i32_0 = arith.constant 0 : i32
    return %arg0, %c0_i32 : i32, i32
  }
  func.func @transform_11(%arg0: i32) -> (i32, i32) {
    %c0_i32 = arith.constant 0 : i32
    %c0_i32_0 = arith.constant 0 : i32
    return %arg0, %c0_i32 : i32, i32
  }
}

</mosaic_0001>

<bundles_post_ra>
// kernel: tpu_custom_call.1
= control target key start
LH: loop header
LB: loop body
LE: loop exit
PB: predicated region body
PF: predicated region fallthrough
CT: control target
= control target key end

     0   :  { %17 = vsyncpa [#allocation3], 0  ;;  %s693_s0 = inlined_call_operand.hbm [shape: f32[16,128], index: 0, kind: input, shape index: {}]   ;;  %s694_s1 = inlined_call_operand.hbm [shape: f32[16,128], index: 1, kind: input, shape index: {}]   ;;  %s695_s2 = inlined_call_operand.hbm [shape: f32[16,128], index: 2, kind: input, shape index: {}]   ;;  %s696_s3 = inlined_call_operand.hbm [shape: f32[16,128], index: 3, kind: input, shape index: {}]   ;;  %s697_s4 = inlined_call_operand.hbm [shape: f32[16,128], index: 4, kind: input, shape index: {}]   ;;  %s698_s5 = inlined_call_operand.hbm [shape: f32[16,128], index: 5, kind: input, shape index: {}]   ;;  %s699_s6 = inlined_call_operand.hbm [shape: f32[16,128], index: 6, kind: input, shape index: {}]   ;;  %s700_s7 = inlined_call_operand.hbm [shape: f32[16,128], index: 7, kind: input, shape index: {}]   ;;  %s701_s8 = inlined_call_operand.hbm [shape: f32[16,128], index: 8, kind: output, shape index: {0}]   ;;  %s702_s9 = inlined_call_operand.hbm [shape: f32[16,128], index: 9, kind: output, shape index: {1}]   ;;  %s703_s10 = inlined_call_operand.hbm [shape: f32[16,128], index: 10, kind: output, shape index: {2}]   ;;  %s704_s11 = inlined_call_operand.hbm [shape: f32[16,128], index: 11, kind: output, shape index: {3}]  }
   0x1   :  { %18 = vsyncpa [#allocation6], 0 }
   0x2   :  { %19 = vsyncpa [#allocation9], 0 }
   0x3   :  { %20 = vsyncpa [#allocation12], 0 }
   0x4   :  { %21 = vsyncpa [#allocation15], 0 }
   0x5   :  { %22 = vsyncpa [#allocation4], 0 }
   0x6   :  { %23 = vsyncpa [#allocation18], 0 }
   0x7   :  { %24 = vsyncpa [#allocation21], 0  ;;  %s523_s17 = smov [#allocation5]   ;;  %s524_s19 = smov [#allocation8]  }
   0x8   :  { %s42_s18 = sshll.u32 %s523_s17, 4  ;;  %s66_s20 = sshll.u32 %s524_s19, 4  ;;  %s43_s18 = int_to_ptr.vmem [resolvable:$true] %s42_s18  ;;  %s67_s20 = int_to_ptr.vmem [resolvable:$true] %s66_s20 }
   0x9   :  { %s275_s21 = scalar_lea.vmem %s43_s18, 256  ;;  %p280_p1 = scmp.lt.s32.totalorder %s43_s18, %s43_s18 }
   0xa   :  { %p276_p0 = scmp.ne.s32.totalorder %s43_s18, %s275_s21  ;;  %p281_p2 = scmp.lt.s32.totalorder %s275_s21, %s275_s21 }
   0xc   :  { %p282_p3 = por %p281_p2, %p280_p1 }
   0xe   :  { %p283_p4 = pnand %p282_p3, %p276_p0 }
  0x10   :  { %286 = shalt.err (!%p283_p4)
}
  0x11   :  { %s525_s22 = smov 128   ;;  %s526_s23 = smov 8  }
  0x12   :  { %48 = dma.hbm_to_vmem [thread:$0]  %s694_s1, 256, %s43_s18, [#allocation6], %s525_s22, %s525_s22, %s526_s23  }
  0x13   :  { %s295_s26 = scalar_lea.vmem %s67_s20, 256  ;;  %p300_p6 = scmp.lt.s32.totalorder %s67_s20, %s67_s20 }
  0x14   :  { %p296_p5 = scmp.ne.s32.totalorder %s67_s20, %s295_s26  ;;  %p301_p7 = scmp.lt.s32.totalorder %s295_s26, %s295_s26 }
  0x16   :  { %p302_p8 = por %p301_p7, %p300_p6 }
  0x18   :  { %p303_p9 = pnand %p302_p8, %p296_p5 }
  0x1a   :  { %306 = shalt.err (!%p303_p9)
}
  0x1b   :  { %72 = dma.hbm_to_vmem [thread:$0]  %s696_s3, 256, %s67_s20, [#allocation9], %s525_s22, %s525_s22, %s526_s23  }
  0x1c   :  { %s527_s29 = smov [#allocation11]   ;;  %s528_s12 = smov [#allocation2]  }
  0x1d   :  { %s90_s30 = sshll.u32 %s527_s29, 4  ;;  %s30_s13 = sshll.u32 %s528_s12, 4  ;;  %s91_s30 = int_to_ptr.vmem [resolvable:$true] %s90_s30  ;;  %s31_s13 = int_to_ptr.vmem [resolvable:$true] %s30_s13 }
  0x1e   :  { %s315_s1 = scalar_lea.vmem %s91_s30, 256  ;;  %p320_p11 = scmp.lt.s32.totalorder %s91_s30, %s91_s30 }
  0x1f   :  { %p316_p10 = scmp.ne.s32.totalorder %s91_s30, %s315_s1  ;;  %p321_p12 = scmp.lt.s32.totalorder %s315_s1, %s315_s1 }
  0x21   :  { %p322_p13 = por %p321_p12, %p320_p11 }
  0x23   :  { %p323_p0 = pnand %p322_p13, %p316_p10 }
  0x25   :  { %326 = shalt.err (!%p323_p0)
}
  0x26   :  { %96 = dma.hbm_to_vmem [thread:$0]  %s698_s5, 256, %s91_s30, [#allocation12], %s525_s22, %s525_s22, %s526_s23  }
  0x27   :  { %s335_s3 = scalar_lea.vmem %s31_s13, 256  ;;  %p340_p2 = scmp.lt.s32.totalorder %s31_s13, %s31_s13 }
  0x28   :  { %p336_p1 = scmp.ne.s32.totalorder %s31_s13, %s335_s3  ;;  %p341_p3 = scmp.lt.s32.totalorder %s335_s3, %s335_s3 }
  0x2a   :  { %p342_p4 = por %p341_p3, %p340_p2 }
  0x2c   :  { %p343_p5 = pnand %p342_p4, %p336_p1 }
  0x2e   :  { %346 = shalt.err (!%p343_p5)
}
  0x2f   :  { %36 = dma.hbm_to_vmem [thread:$0]  %s693_s0, 256, %s31_s13, [#allocation3], %s525_s22, %s525_s22, %s526_s23  }
  0x30   :  { %s529_s18 = smov [#allocation7]   ;;  %s530_s20 = smov [#allocation10]  }
  0x31   :  { %s54_s19 = sshll.u32 %s529_s18, 4  ;;  %s78_s21 = sshll.u32 %s530_s20, 4  ;;  %s55_s19 = int_to_ptr.vmem [resolvable:$true] %s54_s19  ;;  %s79_s21 = int_to_ptr.vmem [resolvable:$true] %s78_s21 }
  0x32   :  { %s355_s5 = scalar_lea.vmem %s55_s19, 256  ;;  %p360_p7 = scmp.lt.s32.totalorder %s55_s19, %s55_s19 }
  0x33   :  { %p356_p6 = scmp.ne.s32.totalorder %s55_s19, %s355_s5  ;;  %p361_p8 = scmp.lt.s32.totalorder %s355_s5, %s355_s5 }
  0x35   :  { %p362_p9 = por %p361_p8, %p360_p7 }
  0x37   :  { %p363_p10 = pnand %p362_p9, %p356_p6 }
  0x39   :  { %366 = shalt.err (!%p363_p10)
}
  0x3a   :  { %60 = dma.hbm_to_vmem [thread:$0]  %s695_s2, 256, %s55_s19, [#allocation6], %s525_s22, %s525_s22, %s526_s23  }
  0x3b   :  { %s375_s0 = scalar_lea.vmem %s79_s21, 256  ;;  %p380_p12 = scmp.lt.s32.totalorder %s79_s21, %s79_s21 }
  0x3c   :  { %p376_p11 = scmp.ne.s32.totalorder %s79_s21, %s375_s0  ;;  %p381_p13 = scmp.lt.s32.totalorder %s375_s0, %s375_s0 }
  0x3e   :  { %p382_p0 = por %p381_p13, %p380_p12 }
  0x40   :  { %p383_p1 = pnand %p382_p0, %p376_p11 }
  0x42   :  { %386 = shalt.err (!%p383_p1)
}
  0x43   :  { %84 = dma.hbm_to_vmem [thread:$0]  %s697_s4, 256, %s79_s21, [#allocation9], %s525_s22, %s525_s22, %s526_s23  }
  0x44   :  { %s531_s28 = smov [#allocation13]   ;;  %s532_s30 = smov [#allocation14]  }
  0x45   :  { %s102_s29 = sshll.u32 %s531_s28, 4  ;;  %s114_s12 = sshll.u32 %s532_s30, 4  ;;  %s103_s29 = int_to_ptr.vmem [resolvable:$true] %s102_s29  ;;  %s115_s12 = int_to_ptr.vmem [resolvable:$true] %s114_s12 }
  0x46   :  { %s395_s2 = scalar_lea.vmem %s103_s29, 256  ;;  %p400_p3 = scmp.lt.s32.totalorder %s103_s29, %s103_s29 }
  0x47   :  { %p396_p2 = scmp.ne.s32.totalorder %s103_s29, %s395_s2  ;;  %p401_p4 = scmp.lt.s32.totalorder %s395_s2, %s395_s2 }
  0x49   :  { %p402_p5 = por %p401_p4, %p400_p3 }
  0x4b   :  { %p403_p6 = pnand %p402_p5, %p396_p2 }
  0x4d   :  { %406 = shalt.err (!%p403_p6)
}
  0x4e   :  { %108 = dma.hbm_to_vmem [thread:$0]  %s699_s6, 256, %s103_s29, [#allocation12], %s525_s22, %s525_s22, %s526_s23  }
  0x4f   :  { %s415_s4 = scalar_lea.vmem %s115_s12, 256  ;;  %p420_p8 = scmp.lt.s32.totalorder %s115_s12, %s115_s12 }
  0x50   :  { %p416_p7 = scmp.ne.s32.totalorder %s115_s12, %s415_s4  ;;  %p421_p9 = scmp.lt.s32.totalorder %s415_s4, %s415_s4 }
  0x52   :  { %p422_p10 = por %p421_p9, %p420_p8 }
  0x54   :  { %p423_p11 = pnand %p422_p10, %p416_p7 }
  0x56   :  { %426 = shalt.err (!%p423_p11)
}
  0x57   :  { %120 = dma.hbm_to_vmem [thread:$0]  %s700_s7, 256, %s115_s12, [#allocation15], %s525_s22, %s525_s22, %s526_s23  }
  0x58   :  { %507 = dma.done.wait [#allocation3], 256  }
  0x59   :  { %508 = vsyncadd [#allocation3], 4294967040 }
  0x5a   :  { %509 = dma.done.wait [#allocation6], 512  }
  0x5b   :  { %510 = vsyncadd [#allocation6], 4294966784 }
  0x5c   :  { %511 = dma.done.wait [#allocation9], 512  }
  0x5d   :  { %512 = vsyncadd [#allocation9], 4294966784 }
  0x5e   :  { %513 = dma.done.wait [#allocation12], 512  }
  0x5f   :  { %514 = vsyncadd [#allocation12], 4294966784 }
  0x60   :  { %515 = dma.done.wait [#allocation15], 256  }
  0x61   :  { %516 = vsyncadd [#allocation15], 4294967040  ;;  %s533_s6 = smov [#allocation17]   ;;  %v155_v0 = vld [vmem:[#allocation5] sm:$0xff]  ;;  %v156_v2 = vld [vmem:[#allocation5 + $0x8] sm:$0xff]  ;;  %s534_s16 = smov [#allocation16]  }
  0x62   :  { %s202_s3 = sshll.u32 %s533_s6, 4  ;;  %v157_v1 = vld [vmem:[#allocation11] sm:$0xff]  ;;  %s645_s17 = sshll.u32 %s534_s16, 4  ;;  %v158_v4 = vld [vmem:[#allocation11 + $0x8] sm:$0xff]  ;;  %v145_v5 = vld [vmem:[#allocation2] sm:$0xff]  ;;  %s203_s3 = int_to_ptr.vmem [resolvable:$true] %s202_s3  ;;  %s648_s17 = int_to_ptr.vmem [resolvable:$true] %s645_s17 }
  0x63   :  { %v159_v3 = vmul.f32 0.05, %v157_v1  ;;  %v147_v6 = vld [vmem:[#allocation10] sm:$0xff]  ;;  %s535_s7 = smov [#allocation19]   ;;  %v160_v7 = vmul.f32 0.05, %v158_v4  ;;  %p432_p13 = scmp.lt.s32.totalorder %s203_s3, %s203_s3 }
  0x64   :  { %s214_s18 = sshll.u32 %s535_s7, 4  ;;  %v149_v8 = vmul.f32 0.05, %v147_v6  ;;  %v146_v9 = vld [vmem:[#allocation2 + $0x8] sm:$0xff]  ;;  %v165_v13 = vld [vmem:[#allocation7] sm:$0xff]  ;;  %s536_s19 = smov [#allocation20]   ;;  %s650_s18 = int_to_ptr.vmem [resolvable:$true] %s214_s18 }
  0x65   :  { %v148_v10 = vld [vmem:[#allocation10 + $0x8] sm:$0xff]  ;;  %v161_v11 = vadd.f32 %v159_v3, %v155_v0  ;;  %v167_v14 = vld [vmem:[#allocation13] sm:$0xff]  ;;  %s226_s20 = sshll.u32 %s536_s19, 4  ;;  %v162_v16 = vadd.f32 %v160_v7, %v156_v2  ;;  %v175_v20 = vld [vmem:[#allocation8] sm:$0xff]  ;;  %s427_s21 = scalar_lea.vmem %s203_s3, 256  ;;  %s652_s20 = int_to_ptr.vmem [resolvable:$true] %s226_s20 }
  0x66   :  { %v150_v12 = vmul.f32 0.05, %v148_v10  ;;  %v166_v15 = vld [vmem:[#allocation7 + $0x8] sm:$0xff]  ;;  %v151_v17 = vadd.f32 %v149_v8, %v145_v5  ;;  %v169_v18 = vmul.f32 0.05, %v167_v14  ;;  %v177_v21 = vld [vmem:[#allocation14] sm:$0xff]  ;;  %p428_p12 = scmp.ne.s32.totalorder %s203_s3, %s427_s21  ;;  %p433_p0 = scmp.lt.s32.totalorder %s427_s21, %s427_s21 }
  0x67   :  { %v168_v19 = vld [vmem:[#allocation13 + $0x8] sm:$0xff]  ;;  %163 = vst [vmem:[#allocation17] sm:$0xff] %v161_v11  ;;  %v179_v24 = vmul.f32 0.05, %v177_v21  ;;  %v176_v25 = vld [vmem:[#allocation8 + $0x8] sm:$0xff]  ;;  %164 = vst [vmem:[#allocation17 + $0x8] sm:$0xff] %v162_v16 }
  0x68   :  { %v152_v22 = vadd.f32 %v150_v12, %v146_v9  ;;  %v170_v23 = vmul.f32 0.05, %v168_v19  ;;  %v178_v26 = vld [vmem:[#allocation14 + $0x8] sm:$0xff]  ;;  %153 = vst [vmem:[#allocation16] sm:$0xff] %v151_v17  ;;  %v171_v27 = vadd.f32 %v169_v18, %v165_v13  ;;  %p434_p1 = por %p433_p0, %p432_p13 }
  0x69   :  { %v180_v28 = vmul.f32 0.05, %v178_v26  ;;  %v181_v30 = vadd.f32 %v179_v24, %v175_v20 }
  0x6a   :  { %154 = vst [vmem:[#allocation16 + $0x8] sm:$0xff] %v152_v22  ;;  %v172_v29 = vadd.f32 %v170_v23, %v166_v15  ;;  %p435_p2 = pnand %p434_p1, %p428_p12 }
  0x6c   :  { %438 = shalt.err (!%p435_p2)
}
  0x6d   :  { %208 = dma.vmem_to_hbm [thread:$0]  %s203_s3, 256, %s702_s9, [#allocation18], %s525_s22, %s525_s22, %s526_s23   ;;  %173 = vst [vmem:[#allocation19] sm:$0xff] %v171_v27  ;;  %v182_v31 = vadd.f32 %v180_v28, %v176_v25 }
  0x6e   :  { %s447_s25 = scalar_lea.vmem %s648_s17, 256  ;;  %p452_p4 = scmp.lt.s32.totalorder %s648_s17, %s648_s17 }
  0x6f   :  { %p448_p3 = scmp.ne.s32.totalorder %s648_s17, %s447_s25  ;;  %p453_p5 = scmp.lt.s32.totalorder %s447_s25, %s447_s25 }
  0x71   :  { %p454_p6 = por %p453_p5, %p452_p4 }
  0x73   :  { %p455_p7 = pnand %p454_p6, %p448_p3 }
  0x75   :  { %458 = shalt.err (!%p455_p7)
}
  0x76   :  { %196 = dma.vmem_to_hbm [thread:$0]  %s648_s17, 256, %s701_s8, [#allocation4], %s525_s22, %s525_s22, %s526_s23   ;;  %174 = vst [vmem:[#allocation19 + $0x8] sm:$0xff] %v172_v29  ;;  %183 = vst [vmem:[#allocation20] sm:$0xff] %v181_v30 }
  0x77   :  { %184 = vst [vmem:[#allocation20 + $0x8] sm:$0xff] %v182_v31  ;;  %s467_s9 = scalar_lea.vmem %s650_s18, 256  ;;  %p472_p9 = scmp.lt.s32.totalorder %s650_s18, %s650_s18 }
  0x78   :  { %p468_p8 = scmp.ne.s32.totalorder %s650_s18, %s467_s9  ;;  %p473_p10 = scmp.lt.s32.totalorder %s467_s9, %s467_s9 }
  0x7a   :  { %p474_p11 = por %p473_p10, %p472_p9 }
  0x7c   :  { %p475_p12 = pnand %p474_p11, %p468_p8 }
  0x7e   :  { %478 = shalt.err (!%p475_p12)
}
  0x7f   :  { %220 = dma.vmem_to_hbm [thread:$0]  %s650_s18, 256, %s703_s10, [#allocation18], %s525_s22, %s525_s22, %s526_s23  }
  0x80   :  { %s487_s8 = scalar_lea.vmem %s652_s20, 256  ;;  %p492_p0 = scmp.lt.s32.totalorder %s652_s20, %s652_s20 }
  0x81   :  { %p488_p13 = scmp.ne.s32.totalorder %s652_s20, %s487_s8  ;;  %p493_p1 = scmp.lt.s32.totalorder %s487_s8, %s487_s8 }
  0x83   :  { %p494_p2 = por %p493_p1, %p492_p0 }
  0x85   :  { %p495_p3 = pnand %p494_p2, %p488_p13 }
  0x87   :  { %498 = shalt.err (!%p495_p3)
}
  0x88   :  { %232 = dma.vmem_to_hbm [thread:$0]  %s652_s20, 256, %s704_s11, [#allocation21], %s525_s22, %s525_s22, %s526_s23  }
  0x89   :  { %517 = dma.done.wait [#allocation4], 256  }
  0x8a   :  { %518 = vsyncadd [#allocation4], 4294967040 }
  0x8b   :  { %519 = dma.done.wait [#allocation18], 512  }
  0x8c   :  { %520 = vsyncadd [#allocation18], 4294966784 }
  0x8d   :  { %521 = dma.done.wait [#allocation21], 256  }
  0x8e   :  { %522 = vsyncadd [#allocation21], 4294967040 }
  0x8f   :  { %245 = vsyncpa [#allocation3], 1 }
  0x90   :  { %246 = vsyncpa [#allocation6], 1 }
  0x91   :  { %247 = vsyncpa [#allocation9], 1 }
  0x92   :  { %248 = vsyncpa [#allocation12], 1 }
  0x93   :  { %249 = vsyncpa [#allocation15], 1 }
  0x94   :  { %250 = vsyncpa [#allocation4], 1 }
  0x95   :  { %251 = vsyncpa [#allocation18], 1 }
  0x96   :  { %252 = vsyncpa [#allocation21], 1 }

</bundles_post_ra>
